<compile_context>
chip_gen: v7x
topology: tpu7x:2x2x1
jax: 0.10.0
libtpu: 0.0.40
codegen_flags: <defaults>
</compile_context>

<pallas_src>
import numpy as np

import jax
import jax.numpy as jnp
from jax.experimental import pallas as pl
from jax.experimental.pallas import tpu as pltpu


def make_kernel(C, T, TB, S, SE):
    Cc = C // S
    inv_T = float(1.0 / T)            # compile-time constant, no in-kernel divide

    def kernel(x_ref, w1_ref, wr_ref, w2_ref, wse1t_ref, wse2_ref,
               pcol_ref, bse1_ref, o_ref, res_ref):
        pcol = pcol_ref[...]                                   # (C, K) f32

        def col(j, rows=C):
            return pcol[0:rows, j:j + 1]                       # (rows, 1)

        def tdnn(h_bf16, w_bf16, b, scale, shift):
            # 1x1 conv == channel matmul (bf16 MXU, f32 accumulate),
            # then ReLU, then eval-mode BN folded into scale/shift (f32 VPU).
            y = jnp.dot(w_bf16, h_bf16, preferred_element_type=jnp.float32) + b
            y = jnp.maximum(y, 0.0)
            return y * scale + shift

        x_bf16 = x_ref[...].astype(jnp.bfloat16)               # (C, N)

        # --- TDNN block 1 ---
        h1 = tdnn(x_bf16, w1_ref[...], col(0), col(1), col(2))  # (C, N) f32

        # --- Res2Net block: write chunks into VMEM scratch (no concat) ---
        res_ref[0:Cc, :] = h1[0:Cc, :]
        prev = None
        for i in range(1, S):                                  # static unrolled
            xi = h1[i * Cc:(i + 1) * Cc, :]
            inp = xi if i == 1 else xi + prev
            base = 7 + 3 * (i - 1)
            yi = tdnn(inp.astype(jnp.bfloat16), wr_ref[i - 1],
                      col(base, Cc), col(base + 1, Cc), col(base + 2, Cc))
            res_ref[i * Cc:(i + 1) * Cc, :] = yi
            prev = yi

        # --- TDNN block 2 ---
        h2 = tdnn(res_ref[...].astype(jnp.bfloat16), w2_ref[...],
                  col(3), col(4), col(5))                      # (C, N) f32

        # --- SE block + residual, one batch (T lanes) at a time ---
        wse1t = wse1t_ref[...]                                 # (C, SE) f32
        wse2 = wse2_ref[...]                                   # (C, SE) f32
        bse1 = bse1_ref[...]                                   # (1, SE) f32
        bse2 = col(6)                                          # (C, 1)  f32
        for b in range(TB):                                    # static, small
            sl = slice(b * T, (b + 1) * T)
            h_b = h2[:, sl]                                    # (C, T)
            # lengths=None -> plain mean over time (sum * 1/T, XLU lane reduce)
            s_b = jnp.sum(h_b, axis=1, keepdims=True) * inv_T  # (C, 1)
            # squeeze/excite matvecs on VPU+XLU (no N=1 MXU calls):
            z1 = jnp.sum(wse1t * s_b, axis=0, keepdims=True) + bse1   # (1, SE)
            z1 = jnp.maximum(z1, 0.0)
            z2 = jnp.sum(wse2 * z1, axis=1, keepdims=True) + bse2     # (C, 1)
            gate = jax.nn.sigmoid(z2)
            # residual add (shortcut is None since in_ch == out_ch)
            o_ref[:, sl] = (h_b * gate + x_ref[:, sl]).astype(o_ref.dtype)

    return kernel


def _pick_batches_per_tile(B, T, target_lanes=512):
    """Widest batch-tile (multiple of T lanes) while keeping >=2 grid steps."""
    best = 1
    for tb in range(1, B + 1):
        if B % tb:
            continue
        if B >= 2 and B // tb < 2:      # keep 2+ grid steps for v7x megacore
            continue
        if tb * T <= max(target_lanes, T):
            best = tb
    return best


def seres2net_block(x, params, *, res2net_scale):
    B, C, T = x.shape
    S = res2net_scale
    assert C % S == 0, "channels must be divisible by res2net_scale"
    Cc = C // S
    SE = params["wse1"].shape[0]

    TB = _pick_batches_per_tile(B, T)
    N = TB * T
    n_tiles = B // TB

    # (B, C, T) -> (C, B*T): layout plumbing in the wrapper (pointwise convs).
    x_cbt = jnp.transpose(x, (1, 0, 2)).reshape(C, B * T)

    # bf16 weights for the MXU.
    w1 = params["w1"].astype(jnp.bfloat16)           # (C, C)
    wr = params["wr"].astype(jnp.bfloat16)           # (S-1, Cc, Cc)
    w2 = params["w2"].astype(jnp.bfloat16)           # (C, C)

    # SE weights stay f32 (VPU/XLU path; v5e VPU has no bf16).
    wse1t = jnp.transpose(params["wse1"])            # (C, SE)
    wse2 = params["wse2"]                            # (C, SE)
    bse1 = params["bse1"].reshape(1, SE)             # (1, SE)

    # Stack the small per-channel vectors into one (C, K) f32 slab.
    def pad_col(v):                                  # (c,1) -> (C,)
        v = v[:, 0]
        return jnp.pad(v, (0, C - v.shape[0]))

    col_list = [params["b1"], params["g1"], params["a1"],
                params["b2"], params["g2"], params["a2"],
                params["bse2"]]
    for i in range(S - 1):
        col_list += [params["br"][i], params["gr"][i], params["ar"][i]]
    pcol = jnp.stack([pad_col(v) for v in col_list], axis=1)   # (C, 7+3*(S-1))

    def full_spec(a):
        nd = a.ndim
        return pl.BlockSpec(a.shape, lambda i: (0,) * nd)

    weight_args = [w1, wr, w2, wse1t, wse2, pcol, bse1]

    in_specs = [pl.BlockSpec((C, N), lambda i: (0, i))]
    in_specs += [full_spec(a) for a in weight_args]

    out = pl.pallas_call(
        make_kernel(C, T, TB, S, SE),
        out_shape=jax.ShapeDtypeStruct((C, B * T), x.dtype),
        grid_spec=pltpu.PrefetchScalarGridSpec(
            num_scalar_prefetch=0,
            grid=(n_tiles,),
            in_specs=in_specs,
            out_specs=pl.BlockSpec((C, N), lambda i: (0, i)),
            scratch_shapes=[pltpu.VMEM((C, N), jnp.float32)],
        ),
        compiler_params=pltpu.CompilerParams(
            dimension_semantics=("parallel",),
            vmem_limit_bytes=32 * 1024 * 1024,
        ),
    )(x_cbt, *weight_args)

    # (C, B*T) -> (B, C, T)
    return jnp.transpose(out.reshape(C, B, T), (1, 0, 2))


def init_params(key, C, se_channels, res2net_scale, eps=1e-5):
    """Deterministic synthetic parameters. BN folded to scale/shift (eval)."""
    S = res2net_scale
    Cc = C // S
    keys = jax.random.split(key, 12)

    def conv_w(k, out_c, in_c):
        return jax.random.normal(k, (out_c, in_c), jnp.float32) / np.sqrt(in_c)

    def conv_b(k, out_c):
        return 0.1 * jax.random.normal(k, (out_c, 1), jnp.float32)

    def bn_fold(k, c):
        k1, k2, k3, k4 = jax.random.split(k, 4)
        gamma = 1.0 + 0.1 * jax.random.normal(k1, (c, 1), jnp.float32)
        beta = 0.1 * jax.random.normal(k2, (c, 1), jnp.float32)
        mean = 0.1 * jax.random.normal(k3, (c, 1), jnp.float32)
        var = 1.0 + 0.1 * jnp.abs(jax.random.normal(k4, (c, 1), jnp.float32))
        scale = gamma / jnp.sqrt(var + eps)
        shift = beta - mean * scale
        return scale, shift

    p = {}
    p["w1"] = conv_w(keys[0], C, C)
    p["b1"] = conv_b(keys[1], C)
    p["g1"], p["a1"] = bn_fold(keys[2], C)

    wr, br, gr, ar = [], [], [], []
    for i in range(S - 1):
        kk = jax.random.fold_in(keys[3], i)
        k1, k2, k3 = jax.random.split(kk, 3)
        wr.append(conv_w(k1, Cc, Cc))
        br.append(conv_b(k2, Cc))
        g_, a_ = bn_fold(k3, Cc)
        gr.append(g_)
        ar.append(a_)
    p["wr"] = jnp.stack(wr)
    p["br"] = jnp.stack(br)
    p["gr"] = jnp.stack(gr)
    p["ar"] = jnp.stack(ar)

    p["w2"] = conv_w(keys[4], C, C)
    p["b2"] = conv_b(keys[5], C)
    p["g2"], p["a2"] = bn_fold(keys[6], C)

    p["wse1"] = conv_w(keys[7], se_channels, C)
    p["bse1"] = conv_b(keys[8], se_channels)
    p["wse2"] = conv_w(keys[9], C, se_channels)
    p["bse2"] = conv_b(keys[10], C)
    return p


def ref_forward(x, p, res2net_scale):
    """Pure-JAX reference matching the PyTorch forward (eval-mode BN, f32)."""
    hp = jax.lax.Precision.HIGHEST

    def tdnn(xx, w, b, sc, sh):
        y = jnp.einsum("oc,bct->bot", w, xx, precision=hp) + b[None]
        y = jnp.maximum(y, 0.0)
        return y * sc[None] + sh[None]

    residual = x
    h = tdnn(x, p["w1"], p["b1"], p["g1"], p["a1"])

    S = res2net_scale
    Cc = h.shape[1] // S
    ys = []
    prev = None
    for i in range(S):
        xi = h[:, i * Cc:(i + 1) * Cc, :]
        if i == 0:
            yi = xi
        else:
            inp = xi if i == 1 else xi + prev
            yi = tdnn(inp, p["wr"][i - 1], p["br"][i - 1],
                      p["gr"][i - 1], p["ar"][i - 1])
            prev = yi
        ys.append(yi)
    h = jnp.concatenate(ys, axis=1)

    h = tdnn(h, p["w2"], p["b2"], p["g2"], p["a2"])

    s = jnp.mean(h, axis=2, keepdims=True)
    s = jnp.maximum(
        jnp.einsum("oc,bci->boi", p["wse1"], s, precision=hp) + p["bse1"][None], 0.0)
    g = jax.nn.sigmoid(
        jnp.einsum("oc,bci->boi", p["wse2"], s, precision=hp) + p["bse2"][None])
    h = h * g
    return h + residual


if __name__ == "__main__":
    B, C, T = 2, 64, 128          # (batch, channels, time)
    res2net_scale = 4
    se_channels = 32

    key = jax.random.PRNGKey(0)
    kx, kp = jax.random.split(key)
    x = jax.random.normal(kx, (B, C, T), jnp.float32)
    params = init_params(kp, C, se_channels, res2net_scale)

    out = seres2net_block(x, params, res2net_scale=res2net_scale)
    out = jax.block_until_ready(out)

    ref = ref_forward(x, params, res2net_scale)
    # bf16 MXU operands (f32 accumulate) across the dependent Res2Net chain ->
    # slightly looser tolerance than a pure-f32 kernel.
    np.testing.assert_allclose(np.asarray(out), np.asarray(ref),
                               rtol=5e-2, atol=5e-2)
    print("KERNEL_OK")
</pallas_src>

<mosaic_0001>
module attributes {stable_mosaic.version = 11 : i64} {
  func.func @kernel(%arg0: i32, %arg1: memref<64x128xf32, #tpu.memory_space<vmem>>, %arg2: memref<64x64xbf16, #tpu.memory_space<vmem>>, %arg3: memref<3x16x16xbf16, #tpu.memory_space<vmem>>, %arg4: memref<64x64xbf16, #tpu.memory_space<vmem>>, %arg5: memref<64x32xf32, #tpu.memory_space<vmem>>, %arg6: memref<64x32xf32, #tpu.memory_space<vmem>>, %arg7: memref<64x16xf32, #tpu.memory_space<vmem>>, %arg8: memref<1x32xf32, #tpu.memory_space<vmem>>, %arg9: memref<64x128xf32, #tpu.memory_space<vmem>>, %arg10: memref<64x128xf32, #tpu.memory_space<vmem>>) attributes {dimension_semantics = [#tpu.dimension_semantics<parallel>], iteration_bounds = array<i64: 2>, scalar_prefetch = 0 : i64, scratch_operands = 1 : i64, tpu.core_type = #tpu.core_type<tc>, window_params = [{transform_indices = @transform_0, window_bounds = array<i64: 64, 128>}, {pipeline_mode = #tpu.pipeline_mode<synchronous>, transform_indices = @transform_1, window_bounds = array<i64: 64, 64>}, {pipeline_mode = #tpu.pipeline_mode<synchronous>, transform_indices = @transform_2, window_bounds = array<i64: 3, 16, 16>}, {pipeline_mode = #tpu.pipeline_mode<synchronous>, transform_indices = @transform_3, window_bounds = array<i64: 64, 64>}, {pipeline_mode = #tpu.pipeline_mode<synchronous>, transform_indices = @transform_4, window_bounds = array<i64: 64, 32>}, {pipeline_mode = #tpu.pipeline_mode<synchronous>, transform_indices = @transform_5, window_bounds = array<i64: 64, 32>}, {pipeline_mode = #tpu.pipeline_mode<synchronous>, transform_indices = @transform_6, window_bounds = array<i64: 64, 16>}, {pipeline_mode = #tpu.pipeline_mode<synchronous>, transform_indices = @transform_7, window_bounds = array<i64: 1, 32>}, {transform_indices = @transform_8, window_bounds = array<i64: 64, 128>}]} {
    %c0 = arith.constant 0 : index
    %c0_0 = arith.constant 0 : index
    %0 = vector.load %arg7[%c0, %c0_0] : memref<64x16xf32, #tpu.memory_space<vmem>>, vector<64x16xf32>
    %c0_1 = arith.constant 0 : index
    %c0_2 = arith.constant 0 : index
    %1 = vector.load %arg1[%c0_1, %c0_2] : memref<64x128xf32, #tpu.memory_space<vmem>>, vector<64x128xf32>
    %2 = arith.truncf %1 : vector<64x128xf32> to vector<64x128xbf16>
    %c0_3 = arith.constant 0 : index
    %c0_4 = arith.constant 0 : index
    %3 = vector.load %arg2[%c0_3, %c0_4] : memref<64x64xbf16, #tpu.memory_space<vmem>>, vector<64x64xbf16>
    %4 = vector.extract_strided_slice %0 {offsets = [0, 0], sizes = [64, 1], strides = [1, 1]} : vector<64x16xf32> to vector<64x1xf32>
    %5 = vector.extract_strided_slice %0 {offsets = [0, 1], sizes = [64, 1], strides = [1, 1]} : vector<64x16xf32> to vector<64x1xf32>
    %6 = vector.extract_strided_slice %0 {offsets = [0, 2], sizes = [64, 1], strides = [1, 1]} : vector<64x16xf32> to vector<64x1xf32>
    %cst = arith.constant dense<0.000000e+00> : vector<64x128xf32>
    %7 = tpu.matmul %3, %2, %cst {dimension_numbers = #tpu.dot_dimension_numbers<[1], [0], [0], [1], [0, 0, 1, 1], [], []>} : vector<64x64xbf16>, vector<64x128xbf16>, vector<64x128xf32> -> vector<64x128xf32>
    %8 = vector.broadcast %4 : vector<64x1xf32> to vector<64x128xf32>
    %9 = arith.addf %7, %8 : vector<64x128xf32>
    %cst_5 = arith.constant 0.000000e+00 : f32
    %10 = vector.broadcast %cst_5 : f32 to vector<64x128xf32>
    %11 = arith.maximumf %9, %10 : vector<64x128xf32>
    %12 = vector.broadcast %5 : vector<64x1xf32> to vector<64x128xf32>
    %13 = arith.mulf %11, %12 : vector<64x128xf32>
    %14 = vector.broadcast %6 : vector<64x1xf32> to vector<64x128xf32>
    %15 = arith.addf %13, %14 : vector<64x128xf32>
    %16 = vector.extract_strided_slice %15 {offsets = [0, 0], sizes = [16, 128], strides = [1, 1]} : vector<64x128xf32> to vector<16x128xf32>
    %c0_6 = arith.constant 0 : index
    %c0_7 = arith.constant 0 : index
    %17 = vector.load %arg10[%c0_6, %c0_7] : memref<64x128xf32, #tpu.memory_space<vmem>>, vector<16x128xf32>
    tpu.vector_store %arg10[%c0_6, %c0_7], %16 {strides = array<i32>} : memref<64x128xf32, #tpu.memory_space<vmem>>, vector<16x128xf32>,
    %18 = vector.extract_strided_slice %15 {offsets = [16, 0], sizes = [16, 128], strides = [1, 1]} : vector<64x128xf32> to vector<16x128xf32>
    %19 = arith.truncf %18 : vector<16x128xf32> to vector<16x128xbf16>
    %c0_8 = arith.constant 0 : index
    %c0_9 = arith.constant 0 : index
    %c0_10 = arith.constant 0 : index
    %20 = vector.load %arg3[%c0_8, %c0_9, %c0_10] : memref<3x16x16xbf16, #tpu.memory_space<vmem>>, vector<1x16x16xbf16>
    %21 = vector.shape_cast %20 : vector<1x16x16xbf16> to vector<16x16xbf16>
    %22 = vector.extract_strided_slice %0 {offsets = [0, 7], sizes = [16, 1], strides = [1, 1]} : vector<64x16xf32> to vector<16x1xf32>
    %23 = vector.extract_strided_slice %0 {offsets = [0, 8], sizes = [16, 1], strides = [1, 1]} : vector<64x16xf32> to vector<16x1xf32>
    %24 = vector.extract_strided_slice %0 {offsets = [0, 9], sizes = [16, 1], strides = [1, 1]} : vector<64x16xf32> to vector<16x1xf32>
    %cst_11 = arith.constant dense<0.000000e+00> : vector<16x128xf32>
    %25 = tpu.matmul %21, %19, %cst_11 {dimension_numbers = #tpu.dot_dimension_numbers<[1], [0], [0], [1], [0, 0, 1, 1], [], []>} : vector<16x16xbf16>, vector<16x128xbf16>, vector<16x128xf32> -> vector<16x128xf32>
    %26 = vector.broadcast %22 : vector<16x1xf32> to vector<16x128xf32>
    %27 = arith.addf %25, %26 : vector<16x128xf32>
    %cst_12 = arith.constant 0.000000e+00 : f32
    %28 = vector.broadcast %cst_12 : f32 to vector<16x128xf32>
    %29 = arith.maximumf %27, %28 : vector<16x128xf32>
    %30 = vector.broadcast %23 : vector<16x1xf32> to vector<16x128xf32>
    %31 = arith.mulf %29, %30 : vector<16x128xf32>
    %32 = vector.broadcast %24 : vector<16x1xf32> to vector<16x128xf32>
    %33 = arith.addf %31, %32 : vector<16x128xf32>
    %c16 = arith.constant 16 : index
    %c0_13 = arith.constant 0 : index
    %34 = vector.load %arg10[%c16, %c0_13] : memref<64x128xf32, #tpu.memory_space<vmem>>, vector<16x128xf32>
    tpu.vector_store %arg10[%c16, %c0_13], %33 {strides = array<i32>} : memref<64x128xf32, #tpu.memory_space<vmem>>, vector<16x128xf32>,
    %35 = vector.extract_strided_slice %15 {offsets = [32, 0], sizes = [16, 128], strides = [1, 1]} : vector<64x128xf32> to vector<16x128xf32>
    %36 = arith.addf %35, %33 : vector<16x128xf32>
    %37 = arith.truncf %36 : vector<16x128xf32> to vector<16x128xbf16>
    %c1 = arith.constant 1 : index
    %c0_14 = arith.constant 0 : index
    %c0_15 = arith.constant 0 : index
    %38 = vector.load %arg3[%c1, %c0_14, %c0_15] : memref<3x16x16xbf16, #tpu.memory_space<vmem>>, vector<1x16x16xbf16>
    %39 = vector.shape_cast %38 : vector<1x16x16xbf16> to vector<16x16xbf16>
    %40 = vector.extract_strided_slice %0 {offsets = [0, 10], sizes = [16, 1], strides = [1, 1]} : vector<64x16xf32> to vector<16x1xf32>
    %41 = vector.extract_strided_slice %0 {offsets = [0, 11], sizes = [16, 1], strides = [1, 1]} : vector<64x16xf32> to vector<16x1xf32>
    %42 = vector.extract_strided_slice %0 {offsets = [0, 12], sizes = [16, 1], strides = [1, 1]} : vector<64x16xf32> to vector<16x1xf32>
    %cst_16 = arith.constant dense<0.000000e+00> : vector<16x128xf32>
    %43 = tpu.matmul %39, %37, %cst_16 {dimension_numbers = #tpu.dot_dimension_numbers<[1], [0], [0], [1], [0, 0, 1, 1], [], []>} : vector<16x16xbf16>, vector<16x128xbf16>, vector<16x128xf32> -> vector<16x128xf32>
    %44 = vector.broadcast %40 : vector<16x1xf32> to vector<16x128xf32>
    %45 = arith.addf %43, %44 : vector<16x128xf32>
    %cst_17 = arith.constant 0.000000e+00 : f32
    %46 = vector.broadcast %cst_17 : f32 to vector<16x128xf32>
    %47 = arith.maximumf %45, %46 : vector<16x128xf32>
    %48 = vector.broadcast %41 : vector<16x1xf32> to vector<16x128xf32>
    %49 = arith.mulf %47, %48 : vector<16x128xf32>
    %50 = vector.broadcast %42 : vector<16x1xf32> to vector<16x128xf32>
    %51 = arith.addf %49, %50 : vector<16x128xf32>
    %c32 = arith.constant 32 : index
    %c0_18 = arith.constant 0 : index
    %52 = vector.load %arg10[%c32, %c0_18] : memref<64x128xf32, #tpu.memory_space<vmem>>, vector<16x128xf32>
    tpu.vector_store %arg10[%c32, %c0_18], %51 {strides = array<i32>} : memref<64x128xf32, #tpu.memory_space<vmem>>, vector<16x128xf32>,
    %53 = vector.extract_strided_slice %15 {offsets = [48, 0], sizes = [16, 128], strides = [1, 1]} : vector<64x128xf32> to vector<16x128xf32>
    %54 = arith.addf %53, %51 : vector<16x128xf32>
    %55 = arith.truncf %54 : vector<16x128xf32> to vector<16x128xbf16>
    %c2 = arith.constant 2 : index
    %c0_19 = arith.constant 0 : index
    %c0_20 = arith.constant 0 : index
    %56 = vector.load %arg3[%c2, %c0_19, %c0_20] : memref<3x16x16xbf16, #tpu.memory_space<vmem>>, vector<1x16x16xbf16>
    %57 = vector.shape_cast %56 : vector<1x16x16xbf16> to vector<16x16xbf16>
    %58 = vector.extract_strided_slice %0 {offsets = [0, 13], sizes = [16, 1], strides = [1, 1]} : vector<64x16xf32> to vector<16x1xf32>
    %59 = vector.extract_strided_slice %0 {offsets = [0, 14], sizes = [16, 1], strides = [1, 1]} : vector<64x16xf32> to vector<16x1xf32>
    %60 = vector.extract_strided_slice %0 {offsets = [0, 15], sizes = [16, 1], strides = [1, 1]} : vector<64x16xf32> to vector<16x1xf32>
    %cst_21 = arith.constant dense<0.000000e+00> : vector<16x128xf32>
    %61 = tpu.matmul %57, %55, %cst_21 {dimension_numbers = #tpu.dot_dimension_numbers<[1], [0], [0], [1], [0, 0, 1, 1], [], []>} : vector<16x16xbf16>, vector<16x128xbf16>, vector<16x128xf32> -> vector<16x128xf32>
    %62 = vector.broadcast %58 : vector<16x1xf32> to vector<16x128xf32>
    %63 = arith.addf %61, %62 : vector<16x128xf32>
    %cst_22 = arith.constant 0.000000e+00 : f32
    %64 = vector.broadcast %cst_22 : f32 to vector<16x128xf32>
    %65 = arith.maximumf %63, %64 : vector<16x128xf32>
    %66 = vector.broadcast %59 : vector<16x1xf32> to vector<16x128xf32>
    %67 = arith.mulf %65, %66 : vector<16x128xf32>
    %68 = vector.broadcast %60 : vector<16x1xf32> to vector<16x128xf32>
    %69 = arith.addf %67, %68 : vector<16x128xf32>
    %c48 = arith.constant 48 : index
    %c0_23 = arith.constant 0 : index
    %70 = vector.load %arg10[%c48, %c0_23] : memref<64x128xf32, #tpu.memory_space<vmem>>, vector<16x128xf32>
    tpu.vector_store %arg10[%c48, %c0_23], %69 {strides = array<i32>} : memref<64x128xf32, #tpu.memory_space<vmem>>, vector<16x128xf32>,
    %c0_24 = arith.constant 0 : index
    %c0_25 = arith.constant 0 : index
    %71 = vector.load %arg10[%c0_24, %c0_25] : memref<64x128xf32, #tpu.memory_space<vmem>>, vector<64x128xf32>
    %72 = arith.truncf %71 : vector<64x128xf32> to vector<64x128xbf16>
    %c0_26 = arith.constant 0 : index
    %c0_27 = arith.constant 0 : index
    %73 = vector.load %arg4[%c0_26, %c0_27] : memref<64x64xbf16, #tpu.memory_space<vmem>>, vector<64x64xbf16>
    %74 = vector.extract_strided_slice %0 {offsets = [0, 3], sizes = [64, 1], strides = [1, 1]} : vector<64x16xf32> to vector<64x1xf32>
    %75 = vector.extract_strided_slice %0 {offsets = [0, 4], sizes = [64, 1], strides = [1, 1]} : vector<64x16xf32> to vector<64x1xf32>
    %76 = vector.extract_strided_slice %0 {offsets = [0, 5], sizes = [64, 1], strides = [1, 1]} : vector<64x16xf32> to vector<64x1xf32>
    %cst_28 = arith.constant dense<0.000000e+00> : vector<64x128xf32>
    %77 = tpu.matmul %73, %72, %cst_28 {dimension_numbers = #tpu.dot_dimension_numbers<[1], [0], [0], [1], [0, 0, 1, 1], [], []>} : vector<64x64xbf16>, vector<64x128xbf16>, vector<64x128xf32> -> vector<64x128xf32>
    %78 = vector.broadcast %74 : vector<64x1xf32> to vector<64x128xf32>
    %79 = arith.addf %77, %78 : vector<64x128xf32>
    %cst_29 = arith.constant 0.000000e+00 : f32
    %80 = vector.broadcast %cst_29 : f32 to vector<64x128xf32>
    %81 = arith.maximumf %79, %80 : vector<64x128xf32>
    %82 = vector.broadcast %75 : vector<64x1xf32> to vector<64x128xf32>
    %83 = arith.mulf %81, %82 : vector<64x128xf32>
    %84 = vector.broadcast %76 : vector<64x1xf32> to vector<64x128xf32>
    %85 = arith.addf %83, %84 : vector<64x128xf32>
    %c0_30 = arith.constant 0 : index
    %c0_31 = arith.constant 0 : index
    %86 = vector.load %arg5[%c0_30, %c0_31] : memref<64x32xf32, #tpu.memory_space<vmem>>, vector<64x32xf32>
    %c0_32 = arith.constant 0 : index
    %c0_33 = arith.constant 0 : index
    %87 = vector.load %arg6[%c0_32, %c0_33] : memref<64x32xf32, #tpu.memory_space<vmem>>, vector<64x32xf32>
    %c0_34 = arith.constant 0 : index
    %c0_35 = arith.constant 0 : index
    %88 = vector.load %arg8[%c0_34, %c0_35] : memref<1x32xf32, #tpu.memory_space<vmem>>, vector<1x32xf32>
    %89 = vector.extract_strided_slice %0 {offsets = [0, 6], sizes = [64, 1], strides = [1, 1]} : vector<64x16xf32> to vector<64x1xf32>
    %cst_36 = arith.constant dense<0.000000e+00> : vector<64xf32>
    %90 = vector.multi_reduction <add>, %85, %cst_36 [1] : vector<64x128xf32> to vector<64xf32>
    %91 = vector.shape_cast %90 : vector<64xf32> to vector<64x1xf32>
    %cst_37 = arith.constant 7.812500e-03 : f32
    %92 = vector.broadcast %cst_37 : f32 to vector<64x1xf32>
    %93 = arith.mulf %91, %92 : vector<64x1xf32>
    %94 = vector.broadcast %93 : vector<64x1xf32> to vector<64x32xf32>
    %95 = arith.mulf %86, %94 : vector<64x32xf32>
    %cst_38 = arith.constant dense<0.000000e+00> : vector<32xf32>
    %96 = vector.multi_reduction <add>, %95, %cst_38 [0] : vector<64x32xf32> to vector<32xf32>
    %97 = vector.shape_cast %96 : vector<32xf32> to vector<1x32xf32>
    %98 = arith.addf %97, %88 : vector<1x32xf32>
    %cst_39 = arith.constant 0.000000e+00 : f32
    %99 = vector.broadcast %cst_39 : f32 to vector<1x32xf32>
    %100 = arith.maximumf %98, %99 : vector<1x32xf32>
    %101 = vector.broadcast %100 : vector<1x32xf32> to vector<64x32xf32>
    %102 = arith.mulf %87, %101 : vector<64x32xf32>
    %cst_40 = arith.constant dense<0.000000e+00> : vector<64xf32>
    %103 = vector.multi_reduction <add>, %102, %cst_40 [1] : vector<64x32xf32> to vector<64xf32>
    %104 = vector.shape_cast %103 : vector<64xf32> to vector<64x1xf32>
    %105 = arith.addf %104, %89 : vector<64x1xf32>
    %106 = arith.negf %105 : vector<64x1xf32>
    %107 = math.exp %106 : vector<64x1xf32>
    %cst_41 = arith.constant 1.000000e+00 : f32
    %108 = vector.broadcast %cst_41 : f32 to vector<64x1xf32>
    %109 = arith.addf %108, %107 : vector<64x1xf32>
    %110 = arith.divf %108, %109 : vector<64x1xf32>
    %111 = vector.broadcast %110 : vector<64x1xf32> to vector<64x128xf32>
    %112 = arith.mulf %85, %111 : vector<64x128xf32>
    %c0_42 = arith.constant 0 : index
    %c0_43 = arith.constant 0 : index
    %113 = vector.load %arg1[%c0_42, %c0_43] : memref<64x128xf32, #tpu.memory_space<vmem>>, vector<64x128xf32>
    %114 = arith.addf %112, %113 : vector<64x128xf32>
    %c0_44 = arith.constant 0 : index
    %c0_45 = arith.constant 0 : index
    %115 = vector.load %arg9[%c0_44, %c0_45] : memref<64x128xf32, #tpu.memory_space<vmem>>, vector<64x128xf32>
    tpu.vector_store %arg9[%c0_44, %c0_45], %114 {strides = array<i32>} : memref<64x128xf32, #tpu.memory_space<vmem>>, vector<64x128xf32>,
    return
  }
  func.func @transform_0(%arg0: i32) -> (i32, i32) {
    %c0_i32 = arith.constant 0 : i32
    %c0_i32_0 = arith.constant 0 : i32
    return %c0_i32, %arg0 : i32, i32
  }
  func.func @transform_1(%arg0: i32) -> (i32, i32) {
    %c0_i32 = arith.constant 0 : i32
    %c0_i32_0 = arith.constant 0 : i32
    %c0_i32_1 = arith.constant 0 : i32
    return %c0_i32, %c0_i32_0 : i32, i32
  }
  func.func @transform_2(%arg0: i32) -> (i32, i32, i32) {
    %c0_i32 = arith.constant 0 : i32
    %c0_i32_0 = arith.constant 0 : i32
    %c0_i32_1 = arith.constant 0 : i32
    %c0_i32_2 = arith.constant 0 : i32
    return %c0_i32, %c0_i32_0, %c0_i32_1 : i32, i32, i32
  }
  func.func @transform_3(%arg0: i32) -> (i32, i32) {
    %c0_i32 = arith.constant 0 : i32
    %c0_i32_0 = arith.constant 0 : i32
    %c0_i32_1 = arith.constant 0 : i32
    return %c0_i32, %c0_i32_0 : i32, i32
  }
  func.func @transform_4(%arg0: i32) -> (i32, i32) {
    %c0_i32 = arith.constant 0 : i32
    %c0_i32_0 = arith.constant 0 : i32
    %c0_i32_1 = arith.constant 0 : i32
    return %c0_i32, %c0_i32_0 : i32, i32
  }
  func.func @transform_5(%arg0: i32) -> (i32, i32) {
    %c0_i32 = arith.constant 0 : i32
    %c0_i32_0 = arith.constant 0 : i32
    %c0_i32_1 = arith.constant 0 : i32
    return %c0_i32, %c0_i32_0 : i32, i32
  }
  func.func @transform_6(%arg0: i32) -> (i32, i32) {
    %c0_i32 = arith.constant 0 : i32
    %c0_i32_0 = arith.constant 0 : i32
    %c0_i32_1 = arith.constant 0 : i32
    return %c0_i32, %c0_i32_0 : i32, i32
  }
  func.func @transform_7(%arg0: i32) -> (i32, i32) {
    %c0_i32 = arith.constant 0 : i32
    %c0_i32_0 = arith.constant 0 : i32
    %c0_i32_1 = arith.constant 0 : i32
    return %c0_i32, %c0_i32_0 : i32, i32
  }
  func.func @transform_8(%arg0: i32) -> (i32, i32) {
    %c0_i32 = arith.constant 0 : i32
    %c0_i32_0 = arith.constant 0 : i32
    return %c0_i32, %arg0 : i32, i32
  }
}

</mosaic_0001>

<bundles_post_ra>
// kernel: tpu_custom_call.1
= control target key start
LH: loop header
LB: loop body
LE: loop exit
PB: predicated region body
PF: predicated region fallthrough
CT: control target
= control target key end

     0   :  { %13 = vsyncpa [#allocation5], 0  ;;  %s2355_s0 = inlined_call_operand.vmem [shape: f32[64,256], index: 0, kind: input, shape index: {}]   ;;  %s2356_s1 = inlined_call_operand.vmem [shape: bf16[64,64], index: 1, kind: input, shape index: {}]   ;;  %s2357_s2 = inlined_call_operand.vmem [shape: bf16[3,16,16], index: 2, kind: input, shape index: {}]   ;;  %s2358_s3 = inlined_call_operand.vmem [shape: bf16[64,64], index: 3, kind: input, shape index: {}]   ;;  %s2359_s4 = inlined_call_operand.vmem [shape: f32[64,32], index: 4, kind: input, shape index: {}]   ;;  %s2360_s5 = inlined_call_operand.vmem [shape: f32[64,32], index: 5, kind: input, shape index: {}]   ;;  %s2361_s6 = inlined_call_operand.vmem [shape: f32[64,16], index: 6, kind: input, shape index: {}]   ;;  %s2362_s7 = inlined_call_operand.vmem [shape: f32[1,32], index: 7, kind: input, shape index: {}]   ;;  %s2363_s8 = inlined_call_operand.hbm [shape: f32[64,256], index: 8, kind: output, shape index: {}]  }
   0x1   :  { %15 = vsyncpa [#allocation5 + $0x1], 0  ;;  %s1849_s27 = smov 0   ;;  %s1851_s28 = smov 0  }
   0x2   :  { %s1853_s29 = smov 0   ;;  %s1855_s30 = smov 0  }
   0x3 LB: > { %s1436_s9 = sadd.s32 4294967295, %s1780_s30   ;;  %s1437_s10 = sadd.s32 4294967294, %s1780_s30   ;;  %s1780_s30 = sphi %s1855_s30, %s2369_s30   ;;  %s1776_s29 = sphi %s1853_s29, %s2368_s29   ;;  %s1772_s28 = sphi %s1851_s28, %s2367_s28   ;;  %s1768_s27 = sphi %s1849_s27, %s2366_s27  }
   0x4   : > { %s1872_s11 = sadd.s32 1, %s1780_s30   ;;  %s28_s12 = sadd.s32 1, %s1776_s29 }
   0x5   : > { %s25_s13 = ssub.s32 %s1780_s30, %s1872_s11  ;;  %p35_p0 = scmp.ne.s32.totalorder %s1776_s29, %s1772_s28 }
   0x6   : > { %p26_p1 = scmp.eq.s32.totalorder %s25_s13, 0  ;;  %p36_p2 = scmp.eq.s32.totalorder %s1780_s30, 0 }
   0x7   : > { %p212_p3 = scmp.eq.s32.totalorder %s1436_s9, 1  ;;  %p217_p4 = scmp.ne.s32.totalorder %s1772_s28, %s1768_s27 }
   0x8   : > { %s1885_s14 = scalar_select %p26_p1, %s1776_s29, %s28_s12  }
   0x9   : > { %p37_p5 = por %p36_p2, %p35_p0  ;;  %p1887_p6 = por %p212_p3, %p35_p0 }
   0xa   : > { %p218_p7 = scmp.eq.s32.totalorder %s1437_s10, 1  ;;  %p1439_p9 = scmp.ge.s32.totalorder %s1780_s30, 2 }
   0xc   : > { %p1891_p8 = por %p218_p7, %p217_p4  ;;  %255 = sbr.rel (%p1439_p9) target bundleno = 27 (0x1b), region = 44 }
  0x13   : > { %258 = sbr.rel (!%p37_p5) target bundleno = 27 (0x1b), region = 48  ;;  %s260_s17 = sand.u32 (%p37_p5), 1, %s1776_s29  }
  0x14   : > { %s1441_s18 = sshll.u32 (%p37_p5), %s1780_s30, 3  ;;  %s1440_s19 = sshll.u32 (%p37_p5), %s260_s17, 6 }
  0x15   : > { %s264_s22 = scalar_lea.vmem (%p37_p5), %s2355_s0, %s1441_s18  ;;  %s262_s23 = scalar_lea.vmem (%p37_p5), [#allocation3], %s1440_s19 }
  0x16   : > { %v306_v0 = vld [vmem:[%s264_s22] sm:$0xff] (%p37_p5)  ;;  %v308_v1 = vld [vmem:[%s264_s22 + $0x10] sm:$0xff] (%p37_p5) }
  0x17   : > { %v310_v2 = vld [vmem:[%s264_s22 + $0x20] sm:$0xff] (%p37_p5)  ;;  %307 = vst [vmem:[%s262_s23] sm:$0xff] (%p37_p5), %v306_v0  ;;  %309 = vst [vmem:[%s262_s23 + $0x8] sm:$0xff] (%p37_p5), %v308_v1  ;;  %v312_v3 = vld [vmem:[%s264_s22 + $0x30] sm:$0xff] (%p37_p5) }
  0x18   : > { %311 = vst [vmem:[%s262_s23 + $0x10] sm:$0xff] (%p37_p5), %v310_v2  ;;  %v314_v4 = vld [vmem:[%s264_s22 + $0x40] sm:$0xff] (%p37_p5)  ;;  %v316_v5 = vld [vmem:[%s264_s22 + $0x50] sm:$0xff] (%p37_p5)  ;;  %313 = vst [vmem:[%s262_s23 + $0x18] sm:$0xff] (%p37_p5), %v312_v3 }
  0x19   : > { %315 = vst [vmem:[%s262_s23 + $0x20] sm:$0xff] (%p37_p5), %v314_v4  ;;  %317 = vst [vmem:[%s262_s23 + $0x28] sm:$0xff] (%p37_p5), %v316_v5  ;;  %v318_v6 = vld [vmem:[%s264_s22 + $0x60] sm:$0xff] (%p37_p5)  ;;  %v320_v7 = vld [vmem:[%s264_s22 + $0x70] sm:$0xff] (%p37_p5) }
  0x1a   : > { %319 = vst [vmem:[%s262_s23 + $0x30] sm:$0xff] %v318_v6  ;;  %321 = vst [vmem:[%s262_s23 + $0x38] sm:$0xff] %v320_v7 }
  0x1b PF: > { %p1442_p10 = scmp.ge.s32.totalorder %s1780_s30, 1  ;;  %p326_p11 = scmp.lt.s32.totalorder %s1780_s30, 3 }
  0x1d   : > { %p327_p12 = pnand %p1442_p10, %p326_p11 }
  0x1e   : > { %s333_s24 = sand.u32 (!%p327_p12), 1, %s1772_s28   ;;  %v1909_v8 = vld [vmem:[%s2361_s6 + $0x10] sm:$0xff] (!%p327_p12)  ;;  %v1673_v9 = vld [vmem:[%s2356_s1] sm:$0xff] (!%p327_p12)   ;;  %v1782_v10 = vmov (!%p327_p12), 1   ;;  %vm455_vm0 = vcmask (!%p327_p12), 523264   ;;  %v1923_v11 = vld [vmem:[%s2361_s6 + $0x18] sm:$0xff] (!%p327_p12) }
  0x1f   : > { %330 = sbr.rel (%p327_p12) target bundleno = 1713 (0x6b1), region = 86  ;;  %s1916_s13 = sshll.u32 (!%p327_p12), %s333_s24, 6  ;;  %1624 = vset.pattern.permute.xlu1 (!%p327_p12), %v1782_v10  ;;  %1513 = vmatprep.mubr.msk.bf16.mxu0 (!%p327_p12), %vm455_vm0, %v1673_v9  ;;  %v1783_v17 = vmov (!%p327_p12), 0   ;;  %v1784_v24 = vmov (!%p327_p12), 2   ;;  %v1946_v26 = vld [vmem:[%s2361_s6 + $0x20] sm:$0xff] (!%p327_p12)  ;;  %v1674_v27 = vld [vmem:[%s2356_s1 + $0x8] sm:$0xff] (!%p327_p12)  }
  0x20   : > { %550 = vperm.xlu1 (!%p327_p12), %1624, %v1909_v8   ;;  %s1927_s19 = scalar_lea.vmem (!%p327_p12), [#allocation3], %s1916_s13  ;;  %1623 = vset.pattern.permute.xlu0 (!%p327_p12), %v1783_v17  ;;  %v1958_v28 = vld [vmem:[%s2361_s6] sm:$0xff] (!%p327_p12)  ;;  %v1963_v29 = vld [vmem:[%s2361_s6 + $0x28] sm:$0xff] (!%p327_p12)  ;;  %v1785_v30 = vmov (!%p327_p12), 7   ;;  %v1786_v32 = vmov (!%p327_p12), 8   ;;  %v1787_v33 = vmov (!%p327_p12), 9  }
  0x21   : > { %v375_v12 = vld [vmem:[%s1927_s19] sm:$0xff] (!%p327_p12)  ;;  %v376_v13 = vld [vmem:[%s1927_s19 + $0x8] sm:$0xff] (!%p327_p12)  ;;  %v377_v14 = vld [vmem:[%s1927_s19 + $0x10] sm:$0xff] (!%p327_p12)  ;;  %407 = vperm.xlu0 (!%p327_p12), %1623, %v1909_v8   ;;  %v1788_v36 = vmov (!%p327_p12), 11   ;;  %v1789_v37 = vmov (!%p327_p12), 12   ;;  %v1790_v38 = vmov (!%p327_p12), 10  }
  0x22   : > { %v383_v15 = vpack.c.bf16 (!%p327_p12), %v376_v13, %v375_v12  ;;  %v378_v16 = vld [vmem:[%s1927_s19 + $0x18] sm:$0xff] (!%p327_p12)  ;;  %v379_v19 = vld [vmem:[%s1927_s19 + $0x20] sm:$0xff] (!%p327_p12)  ;;  %v380_v20 = vld [vmem:[%s1927_s19 + $0x28] sm:$0xff] (!%p327_p12)  ;;  %v1791_v41 = vmov (!%p327_p12), 0.0   ;;  %vm1792_vm1 = vmmov (!%p327_p12), 0   ;;  %vm639_vm2 = vcmask (!%p327_p12), 130048  }
  0x23   : > { %v384_v18 = vpack.c.bf16 (!%p327_p12), %v378_v16, %v377_v14  ;;  %v381_v21 = vld [vmem:[%s1927_s19 + $0x30] sm:$0xff] (!%p327_p12)  ;;  %v382_v22 = vld [vmem:[%s1927_s19 + $0x38] sm:$0xff] (!%p327_p12)  ;;  %v385_v23 = vpack.c.bf16 (!%p327_p12), %v380_v20, %v379_v19  ;;  %v1972_v31 = vld [vmem:[%s2361_s6 + $0x8] sm:$0xff] (!%p327_p12)  ;;  %1521 = vmatprep.subr.bf16.mxu1 (!%p327_p12), %v1791_v41  ;;  %1523 = vmatprep.mubr.msk.bf16.mxu1 (!%p327_p12), %vm1792_vm1, %v1791_v41  ;;  %vm1168_vm3 = vcmask (!%p327_p12), 261120   ;;  %s2279_s20 = scalar_lea.vmem (!%p327_p12), [#allocation4], %s1916_s13  ;;  %s1480_s21 = sshll.u32 (!%p327_p12), %s1436_s9, 7 }
  0x24   : > { %1505 = vmatprep.subr.bf16.mxu0 (!%p327_p12), %v383_v15  ;;  %554 = vperm.xlu1 (!%p327_p12), %1624, %v1923_v11   ;;  %v386_v25 = vpack.c.bf16 (!%p327_p12), %v382_v22, %v381_v21  ;;  %v1985_v34 = vld [vmem:[%s2361_s6 + $0x38] sm:$0xff] (!%p327_p12)  ;;  %v1994_v35 = vld [vmem:[%s2361_s6 + $0x30] sm:$0xff] (!%p327_p12)  ;;  %s1369_s13 = sshll.u32 (!%p327_p12), %s2279_s20, 4  ;;  %s2308_s25 = scalar_lea.hbm (!%p327_p12), %s2363_s8, %s1480_s21  ;;  %s2301_s13 = int_to_ptr.vmem [resolvable:$true] %s1369_s13 }
  0x25   : > { %1506 = vmatpush3.bf16.msra.mxu0 (!%p327_p12), %v383_v15  ;;  %412 = vperm.xlu0 (!%p327_p12), %1623, %v1923_v11   ;;  %v1675_v39 = vld [vmem:[%s2356_s1 + $0x10] sm:$0xff] (!%p327_p12)   ;;  %v1676_v40 = vld [vmem:[%s2356_s1 + $0x18] sm:$0xff] (!%p327_p12)   ;;  %s2313_s26 = scalar_lea.sflag (!%p327_p12), [#allocation5], %s333_s24  ;;  %s1718_s9 = scalar_lea.vmem (!%p327_p12), %s2301_s13, 1024 }
  0x26   : > { %1507 = vmatprep.subr.bf16.mxu0 %v384_v18  ;;  %p1719_p13 = scmp.ne.s32.totalorder %s2301_s13, %s1718_s9 }
  0x28   : > { %1626 = vset.pattern.permute.xlu1 %v1784_v24  ;;  %p1720_p0 = pnand %p1719_p13, %p1887_p6 }
  0x29   : > { %1508 = vmatpush3.bf16.msra.mxu0 %v384_v18  ;;  %594 = vperm.xlu1 %1626, %v1923_v11  }
  0x2a   : > { %1509 = vmatprep.subr.bf16.mxu0 %v385_v23  ;;  %1625 = vset.pattern.permute.xlu0 %v1784_v24  ;;  %p1721_p1 = pneg %p1720_p0 }
  0x2b   : > { %590 = vperm.xlu0 %1625, %v1909_v8  }
  0x2d   : > { %1510 = vmatpush3.bf16.msra.mxu0 %v385_v23  ;;  %1627 = vset.pattern.permute.xlu1 %v1783_v17 }
  0x2e   : > { %1511 = vmatprep.subr.bf16.mxu0 %v386_v25  ;;  %417 = vperm.xlu1 %1627, %v1946_v26  }
  0x2f   : > { %1628 = vset.pattern.permute.xlu0 %v1783_v17 }
  0x30   : > { %422 = vperm.xlu0 %1628, %v1963_v29  }
  0x31   : > { %1512 = vmatpush3.bf16.msra.mxu0 %v386_v25 }
  0x32   : > { %1629 = vset.pattern.permute.xlu1 %v1785_v30 }
  0x33   : > { %627 = vperm.xlu1 %1629, %v1958_v28  }
  0x34   : > { %1514 = vmatmul.mubr.msk.bf16.vlgmr.msra.gmra.mrb[0].mxu0 %vm455_vm0, %v1674_v27  ;;  %1630 = vset.pattern.permute.xlu0 %v1782_v10 }
  0x35   : > { %558 = vperm.xlu0 %1630, %v1946_v26   ;;  %1517 = vmatprep.mubr.msk.bf16.mxu0 %vm455_vm0, %v1675_v39 }
  0x37   : > { %631 = vperm.xlu1 %1629, %v1972_v31  }
  0x39   : > { %1633 = vset.pattern.permute.xlu0 %v1786_v32 }
  0x3a   : > { %691 = vperm.xlu0 %1633, %v1972_v31  }
  0x3b   : > { %1631 = vset.pattern.permute.xlu1 %v1782_v10 }
  0x3c   : > { %562 = vperm.xlu1 %1631, %v1963_v29   ;;  %1518 = vmatmul.mubr.msk.bf16.gmra.mrb[4].mxu0 %vm455_vm0, %v1676_v40 }
  0x3e   : > { %1635 = vset.pattern.permute.xlu0 %v1787_v33 }
  0x3f   : > { %697 = vperm.xlu0 %1635, %v1958_v28  }
  0x40   : > { %1632 = vset.pattern.permute.xlu1 %v1786_v32 }
  0x41   : > { %687 = vperm.xlu1 %1632, %v1958_v28  }
  0x43   : > { %1638 = vset.pattern.permute.xlu0 %v1783_v17 }
  0x44   : > { %432 = vperm.xlu0 %1638, %v1985_v34  }
  0x45   : > { %1634 = vset.pattern.permute.xlu1 %v1784_v24 }
  0x46   : > { %598 = vperm.xlu1 %1634, %v1946_v26  }
  0x48   : > { %1640 = vset.pattern.permute.xlu0 %v1782_v10 }
  0x49   : > { %566 = vperm.xlu0 %1640, %v1994_v35  }
  0x4a   : > { %602 = vperm.xlu1 %1634, %v1963_v29  }
  0x4d   : > { %1643 = vset.pattern.permute.xlu0 %v1788_v36 }
  0x4e   : > { %1636 = vset.pattern.permute.xlu1 %v1787_v33  ;;  %778 = vperm.xlu0 %1643, %v1972_v31  }
  0x4f   : > { %701 = vperm.xlu1 %1636, %v1972_v31  }
  0x52   : > { %1645 = vset.pattern.permute.xlu0 %v1789_v37 }
  0x53   : > { %1637 = vset.pattern.permute.xlu1 %v1783_v17  ;;  %784 = vperm.xlu0 %1645, %v1958_v28  }
  0x54   : > { %427 = vperm.xlu1 %1637, %v1994_v35  }
  0x57   : > { %1648 = vset.pattern.permute.xlu0 %v1783_v17 }
  0x58   : > { %1639 = vset.pattern.permute.xlu1 %v1790_v38  ;;  %402 = vperm.xlu0 %1648, %v1972_v31  }
  0x59   : > { %715 = vperm.xlu1 %1639, %v1958_v28  }
  0x5c   : > { %1650 = vset.pattern.permute.xlu0 %v1784_v24 }
  0x5d   : > { %719 = vperm.xlu1 %1639, %v1972_v31   ;;  %582 = vperm.xlu0 %1650, %v1958_v28  }
  0x61   : > { %1641 = vset.pattern.permute.xlu1 %v1782_v10 }
  0x62   : > { %570 = vperm.xlu1 %1641, %v1985_v34  }
  0x66   : > { %1642 = vset.pattern.permute.xlu1 %v1788_v36 }
  0x67   : > { %774 = vperm.xlu1 %1642, %v1958_v28  }
  0x6b   : > { %1644 = vset.pattern.permute.xlu1 %v1784_v24 }
  0x6c   : > { %606 = vperm.xlu1 %1644, %v1994_v35  }
  0x70   : > { %610 = vperm.xlu1 %1644, %v1985_v34  }
  0x74   : > { %1646 = vset.pattern.permute.xlu1 %v1789_v37 }
  0x75   : > { %788 = vperm.xlu1 %1646, %v1972_v31  }
  0x79   : > { %1647 = vset.pattern.permute.xlu1 %v1783_v17 }
  0x7a   : > { %397 = vperm.xlu1 %1647, %v1958_v28  }
  0x7e   : > { %1649 = vset.pattern.permute.xlu1 %v1782_v10 }
  0x7f   : > { %542 = vperm.xlu1 %1649, %v1958_v28  }
  0x83   : > { %546 = vperm.xlu1 %1649, %v1972_v31  }
  0x87   : > { %1651 = vset.pattern.permute.xlu1 %v1784_v24 }
  0x88   : > { %586 = vperm.xlu1 %1651, %v1972_v31  }
  0x9f   : > { %v551_v42 = vpop.permute.xlu1 %550 }
  0xa0   : > { %v408_v51 = vpop.permute.xlu0 %407 }
  0xa3   : > { %v555_v43 = vpop.permute.xlu1 %554 }
  0xa4   : > { %v413_v53 = vpop.permute.xlu0 %412 }
  0xa8   : > { %v595_v44 = vpop.permute.xlu1 %594 }
  0xaa   : > { %v591_v55 = vpop.permute.xlu0 %590 }
  0xad   : > { %v2035_v45 = vpop.permute.xlu1 %417 }
  0xaf   : > { %v423_v57 = vpop.permute.xlu0 %422 }
  0xb2   : > { %v2037_v46 = vpop.permute.xlu1 %627 }
  0xb4   : > { %v559_v60 = vpop.permute.xlu0 %558 }
  0xb6   : > { %v2039_v47 = vpop.permute.xlu1 %631 }
  0xb9   : > { %v2059_v62 = vpop.permute.xlu0 %691 }
  0xbb   : > { %v2041_v48 = vpop.permute.xlu1 %562 }
  0xbe   : > { %v2063_v0 = vpop.permute.xlu0 %697 }
  0xc0   : > { %v2043_v49 = vpop.permute.xlu1 %687 }
  0xc3   : > { %v2067_v2 = vpop.permute.xlu0 %432 }
  0xc5   : > { %v2045_v50 = vpop.permute.xlu1 %598 }
  0xc8   : > { %v2071_v4 = vpop.permute.xlu0 %566 }
  0xc9   : > { %v2047_v52 = vpop.permute.xlu1 %602 }
  0xcd   : > { %v2075_v6 = vpop.permute.xlu0 %778 }
  0xce   : > { %v2049_v54 = vpop.permute.xlu1 %701 }
  0xd2   : > { %v2077_v9 = vpop.permute.xlu0 %784 }
  0xd3   : > { %v2051_v56 = vpop.permute.xlu1 %427 }
  0xd7   : > { %v403_v13 = vpop.permute.xlu0 %402 }
  0xd8   : > { %v2053_v58 = vpop.permute.xlu1 %715 }
  0xdc   : > { %v2055_v59 = vpop.permute.xlu1 %719  ;;  %v583_v33 = vpop.permute.xlu0 %582 }
  0xe1   : > { %v2057_v61 = vpop.permute.xlu1 %570 }
  0xe6   : > { %v2061_v63 = vpop.permute.xlu1 %774 }
  0xeb   : > { %v2065_v1 = vpop.permute.xlu1 %606 }
  0xef   : > { %v2069_v3 = vpop.permute.xlu1 %610 }
  0xf4   : > { %v2073_v5 = vpop.permute.xlu1 %788 }
  0xf9   : > { %v398_v7 = vpop.permute.xlu1 %397 }
  0xfe   : > { %v543_v10 = vpop.permute.xlu1 %542 }
 0x102   : > { %v547_v16 = vpop.permute.xlu1 %546 }
 0x107   : > { %v1515_v12 = vpop.f32.mrb[0].mxu0  ;;  %v587_v36 = vpop.permute.xlu1 %586 }
 0x108   : > { %v511_v14 = vadd.f32 %v1515_v12, %v408_v51  ;;  %v502_v15 = vpop.f32.mrb[1].mxu0 }
 0x109   : > { %v503_v17 = vadd.f32 %v502_v15, %v398_v7  ;;  %v1516_v18 = vpop.f32.mrb[2].mxu0 }
 0x10a   : > { %v535_v19 = vmax.f32 %v511_v14, 0.0  ;;  %v514_v20 = vadd.f32 %v1516_v18, %v413_v53  ;;  %v505_v21 = vpop.f32.mrb[3].mxu0  ;;  %v1677_v53 = vld [vmem:[%s2357_s2] sm:$0xff]  }
 0x10b   : > { %v533_v22 = vmax.f32 %v503_v17, 0.0  ;;  %v506_v23 = vadd.f32 %v505_v21, %v403_v13 }
 0x10c   : > { %v575_v24 = vmul.f32 %v551_v42, %v535_v19  ;;  %v536_v25 = vmax.f32 %v514_v20, 0.0 }
 0x10d   : > { %v534_v27 = vmax.f32 %v506_v23, 0.0  ;;  %v573_v30 = vmul.f32 %v543_v10, %v533_v22 }
 0x10e   : > { %v576_v32 = vmul.f32 %v555_v43, %v536_v25  ;;  %v615_v38 = vadd.f32 %v591_v55, %v575_v24 }
 0x10f   : > { %v574_v37 = vmul.f32 %v547_v16, %v534_v27  ;;  %v613_v40 = vadd.f32 %v583_v33, %v573_v30  ;;  %v1519_v42 = vpop.f32.mrb[4].mxu0 }
 0x110   : > { %v616_v39 = vadd.f32 %v595_v44, %v576_v32  ;;  %v518_v43 = vpop.f32.mrb[5].mxu0 }
 0x111   : > { %v614_v51 = vadd.f32 %v587_v36, %v574_v37  ;;  %v1520_v44 = vpop.f32.mrb[6].mxu0  ;;  %v519_v10 = vadd.f32 %v518_v43, %v2035_v45 }
 0x112   : > { %v623_v12 = vpack.c.bf16 %v616_v39, %v615_v38  ;;  %v521_v55 = vpop.f32.mrb[7].mxu0 }
 0x113   : > { %v2079_v7 = vpack.c.bf16 %v614_v51, %v613_v40  ;;  %v522_v13 = vadd.f32 %v521_v55, %v423_v57  ;;  %v537_v14 = vmax.f32 %v519_v10, 0.0 }
 0x114   : > { %1522 = vmatpush3.bf16.msra.mxu1 %v623_v12 }
 0x115   : > { %1539 = vmatprep.subr.bf16.mxu0 %v2079_v7  ;;  %1527 = vmatprep.subr.bf16.mxu1 %v1791_v41  ;;  %v538_v16 = vmax.f32 %v522_v13, 0.0  ;;  %v577_v20 = vmul.f32 %v559_v60, %v537_v14 }
 0x116   : > { %1540 = vmatpush3.bf16.msra.mxu0 %v2079_v7 }
 0x117   : > { %1524 = vmatmul.mubr.msk.bf16.vlgmr.msra.gmra.mrb[0].mxu1 %vm639_vm2, %v1677_v53  ;;  %v578_v24 = vmul.f32 %v2041_v48, %v538_v16  ;;  %v617_v45 = vadd.f32 %v2045_v50, %v577_v20  ;;  %v1678_v48 = vld [vmem:[%s2357_s2 + $0x8] sm:$0xff]   ;;  %v1794_v50 = vmov 14  }
 0x118   : > { %1529 = vmatprep.mubr.msk.bf16.mxu1 %vm1792_vm1, %v1791_v41 }
 0x1ea   : > { %v677_v15 = vpop.f32.mrb[0].mxu1 }
 0x1eb   : > { %v678_v17 = vadd.f32 %v677_v15, %v2037_v46  ;;  %v1525_v18 = vpop.f32.mrb[1].mxu1  ;;  %v618_v46 = vadd.f32 %v2047_v52, %v578_v24  ;;  %v1795_v52 = vmov 15  }
 0x1ec   : > { %v680_v19 = vpop.f32.mrb[2].mxu1 }
 0x1ed   : > { %v684_v21 = vmax.f32 %v678_v17, 0.0  ;;  %v681_v22 = vadd.f32 %v680_v19, %v2039_v47  ;;  %v1526_v23 = vpop.f32.mrb[3].mxu1 }
 0x1ef   : > { %v694_v25 = vmul.f32 %v2043_v49, %v684_v21  ;;  %v685_v27 = vmax.f32 %v681_v22, 0.0  ;;  %v1793_v49 = vmov 13  }
 0x1f0   : > { %1652 = vset.pattern.permute.xlu1 %v1793_v49  ;;  %1653 = vset.pattern.permute.xlu0 %v1793_v49 }
 0x1f1   : > { %v704_v57 = vadd.f32 %v2063_v0, %v694_v25  ;;  %v695_v30 = vmul.f32 %v2059_v62, %v685_v27  ;;  %802 = vperm.xlu1 %1652, %v1958_v28   ;;  %806 = vperm.xlu0 %1653, %v1972_v31  }
 0x1f3   : > { %v708_v32 = vadd.f32 %v704_v57, %v617_v45  ;;  %v705_v60 = vadd.f32 %v2049_v54, %v695_v30  ;;  %v530_v54 = vadd.f32 %v1520_v44, %v2067_v2 }
 0x1f5   : > { %v709_v33 = vadd.f32 %v705_v60, %v618_v46  ;;  %v891_v36 = vpack.c.bf16 %v705_v60, %v704_v57  ;;  %1654 = vset.pattern.permute.xlu1 %v1794_v50  ;;  %1655 = vset.pattern.permute.xlu0 %v1795_v52  ;;  %v540_v37 = vmax.f32 %v530_v54, 0.0  ;;  %v1683_v60 = vld [vmem:[%s2358_s3 + $0x18] sm:$0xff]  }
 0x1f6   : > { %861 = vperm.xlu1 %1654, %v1958_v28   ;;  %871 = vperm.xlu0 %1655, %v1958_v28  }
 0x1f7   : > { %1541 = vmatprep.subr.bf16.mxu0 %v891_v36  ;;  %v710_v47 = vpack.c.bf16 %v709_v33, %v708_v32  ;;  %v580_v55 = vmul.f32 %v2057_v61, %v540_v37  ;;  %v1679_v61 = vld [vmem:[%s2357_s2 + $0x10] sm:$0xff]   ;;  %v1682_v32 = vld [vmem:[%s2358_s3 + $0x8] sm:$0xff]  }
 0x1f8   : > { %1542 = vmatpush3.bf16.msra.mxu0 %v891_v36 }
 0x1f9   : > { %1528 = vmatpush3.bf16.msra.mxu1 %v710_v47 }
 0x1fa   : > { %1533 = vmatprep.subr.bf16.mxu1 %v1791_v41  ;;  %865 = vperm.xlu1 %1654, %v1972_v31  }
 0x1fc   : > { %1530 = vmatmul.mubr.msk.bf16.vlgmr.msra.gmra.mrb[4].mxu1 %vm639_vm2, %v1678_v48 }
 0x1fd   : > { %1535 = vmatprep.mubr.msk.bf16.mxu1 %vm1792_vm1, %v1791_v41  ;;  %v527_v41 = vadd.f32 %v1519_v42, %v2051_v56 }
 0x1fe   : > { %1656 = vset.pattern.permute.xlu1 %v1795_v52 }
 0x1ff   : > { %875 = vperm.xlu1 %1656, %v1972_v31   ;;  %v539_v62 = vmax.f32 %v527_v41, 0.0 }
 0x201   : > { %v579_v51 = vmul.f32 %v2071_v4, %v539_v62 }
 0x203   : > { %v619_v2 = vadd.f32 %v2065_v1, %v579_v51  ;;  %v1681_v1 = vld [vmem:[%s2358_s3 + $0x10] sm:$0xff]  }
 0x270   : > { %v807_v16 = vpop.permute.xlu0 %806 }
 0x275   : > { %v872_v25 = vpop.permute.xlu0 %871 }
 0x2cf   : > { %v764_v0 = vpop.f32.mrb[4].mxu1 }
 0x2d0   : > { %v765_v38 = vadd.f32 %v764_v0, %v2053_v58  ;;  %v1531_v39 = vpop.f32.mrb[5].mxu1  ;;  %v620_v58 = vadd.f32 %v2069_v3, %v580_v55  ;;  %v1796_v3 = vmov 3  }
 0x2d1   : > { %v767_v40 = vpop.f32.mrb[6].mxu1  ;;  %1657 = vset.pattern.permute.xlu1 %v1796_v3  ;;  %1658 = vset.pattern.permute.xlu0 %v1796_v3 }
 0x2d2   : > { %v771_v12 = vmax.f32 %v765_v38, 0.0  ;;  %v768_v53 = vadd.f32 %v767_v40, %v2055_v59  ;;  %v1532_v43 = vpop.f32.mrb[7].mxu1  ;;  %903 = vperm.xlu1 %1657, %v1958_v28   ;;  %907 = vperm.xlu0 %1658, %v1972_v31  }
 0x2d4   : > { %v781_v10 = vmul.f32 %v2061_v63, %v771_v12  ;;  %v772_v56 = vmax.f32 %v768_v53, 0.0  ;;  %v1680_v63 = vld [vmem:[%s2358_s3] sm:$0xff]  }
 0x2d5   : > { %1547 = vmatprep.mubr.msk.bf16.mxu0 %vm455_vm0, %v1680_v63 }
 0x2d6   : > { %v791_v42 = vadd.f32 %v2077_v9, %v781_v10  ;;  %v782_v44 = vmul.f32 %v2075_v6, %v772_v56  ;;  %911 = vperm.xlu1 %1657, %v1909_v8   ;;  %v1798_v6 = vmov 4  }
 0x2d8   : > { %v795_v13 = vadd.f32 %v791_v42, %v619_v2  ;;  %v792_v4 = vadd.f32 %v2073_v5, %v782_v44  ;;  %v1797_v5 = vmov 5  }
 0x2d9   : > { %1662 = vset.pattern.permute.xlu0 %v1797_v5 }
 0x2da   : > { %v796_v14 = vadd.f32 %v792_v4, %v620_v58  ;;  %v892_v15 = vpack.c.bf16 %v792_v4, %v791_v42  ;;  %1084 = vperm.xlu0 %1662, %v1972_v31   ;;  %915 = vperm.xlu1 %1657, %v1923_v11  }
 0x2dc   : > { %1543 = vmatprep.subr.bf16.mxu0 %v892_v15  ;;  %v797_v59 = vpack.c.bf16 %v796_v14, %v795_v13 }
 0x2dd   : > { %1544 = vmatpush3.bf16.msra.mxu0 %v892_v15 }
 0x2de   : > { %1534 = vmatpush3.bf16.msra.mxu1 %v797_v59  ;;  %1088 = vperm.xlu0 %1662, %v1909_v8  }
 0x2df   : > { %1555 = vmatprep.subr.bf16.mxu1 %v2079_v7  ;;  %1659 = vset.pattern.permute.xlu1 %v1798_v6 }
 0x2e0   : > { %1044 = vperm.xlu1 %1659, %v1972_v31  }
 0x2e1   : > { %1536 = vmatmul.mubr.msk.bf16.vlgmr.msra.gmra.mrb[8].mxu1 %vm639_vm2, %v1679_v61 }
 0x2e2   : > { %1559 = vmatpush3.bf16.msra.mxu1 %v2079_v7  ;;  %1551 = vmatprep.mubr.msk.bf16.mxu1 %vm455_vm0, %v1681_v1 }
 0x2e3   : > { %1556 = vmatprep.subr.bf16.mxu1 %v891_v36  ;;  %1665 = vset.pattern.permute.xlu0 %v1798_v6 }
 0x2e4   : > { %1040 = vperm.xlu0 %1665, %v1958_v28   ;;  %1660 = vset.pattern.permute.xlu1 %v1796_v3 }
 0x2e5   : > { %919 = vperm.xlu1 %1660, %v1946_v26  }
 0x2e6   : > { %1560 = vmatpush3.bf16.msra.mxu1 %v891_v36 }
 0x2e7   : > { %1557 = vmatprep.subr.bf16.mxu1 %v892_v15 }
 0x2e8   : > { %1048 = vperm.xlu0 %1665, %v1909_v8   ;;  %v803_v8 = vpop.permute.xlu1 %802 }
 0x2e9   : > { %1661 = vset.pattern.permute.xlu1 %v1797_v5 }
 0x2ea   : > { %1561 = vmatpush3.bf16.msra.mxu1 %v892_v15  ;;  %1080 = vperm.xlu1 %1661, %v1958_v28  }
 0x2ec   : > { %1056 = vperm.xlu0 %1665, %v1946_v26   ;;  %v862_v9 = vpop.permute.xlu1 %861 }
 0x2ee   : > { %1663 = vset.pattern.permute.xlu1 %v1796_v3 }
 0x2ef   : > { %923 = vperm.xlu1 %1663, %v1963_v29  }
 0x2f0   : > { %1060 = vperm.xlu0 %1665, %v1963_v29   ;;  %v866_v20 = vpop.permute.xlu1 %865 }
 0x2f3   : > { %1664 = vset.pattern.permute.xlu1 %v1798_v6 }
 0x2f4   : > { %1064 = vperm.xlu0 %1665, %v1994_v35   ;;  %1052 = vperm.xlu1 %1664, %v1923_v11   ;;  %v876_v27 = vpop.permute.xlu1 %875 }
 0x2f8   : > { %1068 = vperm.xlu0 %1665, %v1985_v34   ;;  %1666 = vset.pattern.permute.xlu1 %v1796_v3 }
 0x2f9   : > { %927 = vperm.xlu1 %1666, %v1994_v35  }
 0x2fc   : > { %1670 = vset.pattern.permute.xlu0 %v1797_v5 }
 0x2fd   : > { %1108 = vperm.xlu0 %1670, %v1985_v34   ;;  %1667 = vset.pattern.permute.xlu1 %v1797_v5 }
 0x2fe   : > { %1092 = vperm.xlu1 %1667, %v1923_v11  }
 0x302   : > { %1668 = vset.pattern.permute.xlu1 %v1796_v3 }
 0x303   : > { %931 = vperm.xlu1 %1668, %v1985_v34  }
 0x307   : > { %1669 = vset.pattern.permute.xlu1 %v1797_v5 }
 0x308   : > { %1096 = vperm.xlu1 %1669, %v1946_v26  }
 0x30c   : > { %1100 = vperm.xlu1 %1669, %v1963_v29  }
 0x310   : > { %1104 = vperm.xlu1 %1669, %v1994_v35  }
 0x351   : > { %v904_v33 = vpop.permute.xlu1 %903  ;;  %v908_v49 = vpop.permute.xlu0 %907 }
 0x355   : > { %v912_v36 = vpop.permute.xlu1 %911 }
 0x359   : > { %v916_v47 = vpop.permute.xlu1 %915  ;;  %v1085_v52 = vpop.permute.xlu0 %1084 }
 0x35d   : > { %v1089_v54 = vpop.permute.xlu0 %1088 }
 0x35f   : > { %v1045_v48 = vpop.permute.xlu1 %1044 }
 0x363   : > { %v1041_v0 = vpop.permute.xlu0 %1040 }
 0x364   : > { %v920_v50 = vpop.permute.xlu1 %919 }
 0x367   : > { %v1049_v38 = vpop.permute.xlu0 %1048 }
 0x369   : > { %v1081_v41 = vpop.permute.xlu1 %1080 }
 0x36b   : > { %v1057_v40 = vpop.permute.xlu0 %1056 }
 0x36e   : > { %v924_v62 = vpop.permute.xlu1 %923 }
 0x36f   : > { %v1061_v12 = vpop.permute.xlu0 %1060 }
 0x373   : > { %v1053_v37 = vpop.permute.xlu1 %1052 }
 0x378   : > { %v928_v39 = vpop.permute.xlu1 %927 }
 0x37d   : > { %v1093_v51 = vpop.permute.xlu1 %1092 }
 0x382   : > { %v932_v53 = vpop.permute.xlu1 %931 }
 0x387   : > { %v1097_v1 = vpop.permute.xlu1 %1096 }
 0x3b4   : > { %v851_v7 = vpop.f32.mrb[8].mxu1 }
 0x3b5   : > { %v852_v17 = vadd.f32 %v851_v7, %v803_v8  ;;  %v1537_v18 = vpop.f32.mrb[9].mxu1 }
 0x3b6   : > { %v854_v19 = vpop.f32.mrb[10].mxu1 }
 0x3b7   : > { %v858_v21 = vmax.f32 %v852_v17, 0.0  ;;  %v855_v11 = vadd.f32 %v854_v19, %v807_v16  ;;  %v1538_v22 = vpop.f32.mrb[11].mxu1  ;;  %v1065_v19 = vpop.permute.xlu0 %1064 }
 0x3b9   : > { %v859_v23 = vmax.f32 %v855_v11, 0.0  ;;  %v868_v24 = vmul.f32 %v862_v9, %v858_v21 }
 0x3bb   : > { %v869_v45 = vmul.f32 %v866_v20, %v859_v23  ;;  %v878_v57 = vadd.f32 %v872_v25, %v868_v24  ;;  %v1101_v23 = vpop.permute.xlu1 %1100 }
 0x3bd   : > { %v879_v30 = vadd.f32 %v876_v27, %v869_v45 }
 0x3bf   : > { %v893_v46 = vpack.c.bf16 %v879_v30, %v878_v57 }
 0x3c1   : > { %1545 = vmatprep.subr.bf16.mxu0 %v893_v46  ;;  %1558 = vmatprep.subr.bf16.mxu1 %v893_v46 }
 0x3c2   : > { %1546 = vmatpush3.bf16.msra.mxu0 %v893_v46  ;;  %1562 = vmatpush3.bf16.msra.mxu1 %v893_v46  ;;  %v1069_v46 = vpop.permute.xlu0 %1068 }
 0x3c5   : > { %1548 = vmatmul.mubr.msk.bf16.vlgmr.msra.gmra.mrb[8].mxu0 %vm455_vm0, %v1682_v32  ;;  %1552 = vmatmul.mubr.msk.bf16.vlgmr.msra.gmra.mrb[12].mxu1 %vm455_vm0, %v1683_v60 }
 0x498   : > { %v1549_v43 = vpop.f32.mrb[8].mxu0  ;;  %v1553_v55 = vpop.f32.mrb[12].mxu1 }
 0x499   : > { %v1009_v10 = vadd.f32 %v1549_v43, %v912_v36  ;;  %v1000_v56 = vpop.f32.mrb[9].mxu0  ;;  %v1016_v2 = vpop.f32.mrb[13].mxu1  ;;  %v1025_v9 = vadd.f32 %v1553_v55, %v928_v39  ;;  %v1121_v39 = vld [vmem:[%s2359_s4 + $0x10] sm:$0xff] }
 0x49a   : > { %v1001_v42 = vadd.f32 %v1000_v56, %v904_v33  ;;  %v1550_v44 = vpop.f32.mrb[10].mxu0  ;;  %v1554_v58 = vpop.f32.mrb[14].mxu1  ;;  %v1017_v61 = vadd.f32 %v1016_v2, %v920_v50 }
 0x49b   : > { %v1012_v13 = vadd.f32 %v1550_v44, %v916_v47  ;;  %v1003_v4 = vpop.f32.mrb[11].mxu0  ;;  %v1019_v14 = vpop.f32.mrb[15].mxu1  ;;  %v1033_v15 = vmax.f32 %v1009_v10, 0.0  ;;  %v1028_v21 = vadd.f32 %v1554_v58, %v932_v53  ;;  %v1037_v24 = vmax.f32 %v1025_v9, 0.0  ;;  %v1122_v53 = vld [vmem:[%s2359_s4 + $0x18] sm:$0xff]  ;;  %v1123_v44 = vld [vmem:[%s2359_s4 + $0x20] sm:$0xff] }
 0x49c   : > { %v1031_v59 = vmax.f32 %v1001_v42, 0.0  ;;  %v1004_v63 = vadd.f32 %v1003_v4, %v908_v49  ;;  %v1020_v8 = vadd.f32 %v1019_v14, %v924_v62  ;;  %v1035_v16 = vmax.f32 %v1017_v61, 0.0  ;;  %v1105_v33 = vpop.permute.xlu1 %1104  ;;  %v1120_v62 = vld [vmem:[%s2359_s4 + $0x8] sm:$0xff] }
 0x49d   : > { %v1034_v5 = vmax.f32 %v1012_v13, 0.0  ;;  %v1073_v7 = vmul.f32 %v1049_v38, %v1033_v15  ;;  %v1038_v45 = vmax.f32 %v1028_v21, 0.0  ;;  %v1077_v32 = vmul.f32 %v1065_v19, %v1037_v24  ;;  %v1126_v19 = vld [vmem:[%s2359_s4 + $0x38] sm:$0xff] }
 0x49e   : > { %v1071_v3 = vmul.f32 %v1041_v0, %v1031_v59  ;;  %v1032_v6 = vmax.f32 %v1004_v63, 0.0  ;;  %v1036_v11 = vmax.f32 %v1020_v8, 0.0  ;;  %v1075_v25 = vmul.f32 %v1057_v40, %v1035_v16  ;;  %v1124_v59 = vld [vmem:[%s2359_s4 + $0x28] sm:$0xff] }
 0x49f   : > { %v1074_v20 = vmul.f32 %v1053_v37, %v1034_v5  ;;  %v2177_v27 = vadd.f32 %v1089_v54, %v1073_v7  ;;  %v1078_v36 = vmul.f32 %v1069_v46, %v1038_v45  ;;  %v2188_v49 = vadd.f32 %v1105_v33, %v1077_v32 }
 0x4a0   : > { %v1072_v17 = vmul.f32 %v1045_v48, %v1032_v6  ;;  %v2171_v18 = vadd.f32 %v1081_v41, %v1071_v3  ;;  %v1076_v57 = vmul.f32 %v1061_v12, %v1036_v11  ;;  %v2183_v60 = vadd.f32 %v1097_v1, %v1075_v25  ;;  %v1109_v48 = vpop.permute.xlu0 %1108  ;;  %v1125_v6 = vld [vmem:[%s2359_s4 + $0x30] sm:$0xff] }
 0x4a1   : > { %v2180_v30 = vadd.f32 %v1093_v51, %v1074_v20  ;;  %v2191_v50 = vadd.f32 %v1109_v48, %v1078_v36  ;;  %v1192_v48 = vlaneseq }
 0x4a2   : > { %1136 = vadd.xlane.f32.xlu1 %v2171_v18  ;;  %v2174_v22 = vadd.f32 %v1085_v52, %v1072_v17  ;;  %v2186_v47 = vadd.f32 %v1101_v23, %v1076_v57  ;;  %v1119_v52 = vld [vmem:[%s2359_s4] sm:$0xff] }
 0x4a4   : > { %1138 = vadd.xlane.f32.xlu0 %v2174_v22 }
 0x4a6   : > { %1140 = vadd.xlane.f32.xlu1 %v2177_v27 }
 0x4a8   : > { %1142 = vadd.xlane.f32.xlu0 %v2180_v30 }
 0x4aa   : > { %1144 = vadd.xlane.f32.xlu1 %v2183_v60 }
 0x4ac   : > { %1146 = vadd.xlane.f32.xlu0 %v2186_v47 }
 0x4ae   : > { %1148 = vadd.xlane.f32.xlu1 %v2188_v49 }
 0x4b0   : > { %1150 = vadd.xlane.f32.xlu0 %v2191_v50 }
 0x52f   : > { %v1137_v41 = vpop.xlane.xlu1 %1136 }
 0x530   : > { %v1152_v54 = vmul.f32 0.0078125, %v1137_v41 }
 0x531   : > { %v1139_v0 = vpop.xlane.xlu0 %1138 }
 0x532   : > { %v1160_v37 = vmul.f32 %v1152_v54, %v1119_v52  ;;  %v1153_v38 = vmul.f32 0.0078125, %v1139_v0  ;;  %v1193_v54 = vshrl.u32 %v1192_v48, 7  ;;  %v1135_v0 = vld [vmem:[%s2362_s7] sm:$0x1] }
 0x533   : > { %v1141_v40 = vpop.xlane.xlu1 %1140 }
 0x534   : > { %v1161_v51 = vmul.f32 %v1153_v38, %v1120_v62  ;;  %v1154_v12 = vmul.f32 0.0078125, %v1141_v40  ;;  %v1169_v55 = vsel %vm1168_vm3, %v1160_v37, 0.0  ;;  %v1194_v38 = vsub.s32 0, %v1193_v54 }
 0x535   : > { %v1143_v43 = vpop.xlane.xlu0 %1142 }
 0x536   : > { %v1170_v10 = vsel %vm1168_vm3, %v1161_v51, 0.0  ;;  %v1162_v56 = vmul.f32 %v1154_v12, %v1121_v39  ;;  %v1155_v2 = vmul.f32 0.0078125, %v1143_v43  ;;  %v1128_v51 = vld [vmem:[%s2360_s5 + $0x8] sm:$0xff]  ;;  %v1127_v12 = vld [vmem:[%s2360_s5] sm:$0xff]  ;;  %v1130_v43 = vld [vmem:[%s2360_s5 + $0x18] sm:$0xff] }
 0x537   : > { %v1171_v42 = vadd.f32 %v1170_v10, %v1169_v55  ;;  %v1145_v58 = vpop.xlane.xlu1 %1144  ;;  %v1129_v55 = vld [vmem:[%s2360_s5 + $0x10] sm:$0xff] }
 0x538   : > { %v1172_v13 = vsel %vm1168_vm3, %v1162_v56, 0.0  ;;  %v1163_v4 = vmul.f32 %v1155_v2, %v1122_v53  ;;  %v1156_v14 = vmul.f32 0.0078125, %v1145_v58 }
 0x539   : > { %v1173_v15 = vadd.f32 %v1172_v13, %v1171_v42  ;;  %v1147_v61 = vpop.xlane.xlu0 %1146  ;;  %v1132_v13 = vld [vmem:[%s2360_s5 + $0x28] sm:$0xff] }
 0x53a   : > { %v1174_v63 = vsel %vm1168_vm3, %v1163_v4, 0.0  ;;  %v1164_v1 = vmul.f32 %v1156_v14, %v1123_v44  ;;  %v1157_v3 = vmul.f32 0.0078125, %v1147_v61  ;;  %v1131_v4 = vld [vmem:[%s2360_s5 + $0x20] sm:$0xff] }
 0x53b   : > { %v1175_v5 = vadd.f32 %v1174_v63, %v1173_v15  ;;  %v1149_v8 = vpop.xlane.xlu1 %1148  ;;  %v1134_v63 = vld [vmem:[%s2360_s5 + $0x38] sm:$0xff] }
 0x53c   : > { %v1176_v9 = vsel %vm1168_vm3, %v1164_v1, 0.0  ;;  %v1165_v7 = vmul.f32 %v1157_v3, %v1124_v59  ;;  %v1158_v16 = vmul.f32 0.0078125, %v1149_v8  ;;  %v1133_v1 = vld [vmem:[%s2360_s5 + $0x30] sm:$0xff] }
 0x53d   : > { %v1177_v17 = vadd.f32 %v1176_v9, %v1175_v5  ;;  %v1151_v20 = vpop.xlane.xlu0 %1150 }
 0x53e   : > { %v1178_v21 = vsel %vm1168_vm3, %v1165_v7, 0.0  ;;  %v1166_v11 = vmul.f32 %v1158_v16, %v1125_v6  ;;  %v1159_v23 = vmul.f32 0.0078125, %v1151_v20  ;;  %v1799_v16 = vmov 6  }
 0x53f   : > { %v1179_v24 = vadd.f32 %v1178_v21, %v1177_v17  ;;  %1672 = vset.pattern.permute.xlu0 %v1799_v16  ;;  %1671 = vset.pattern.permute.xlu1 %v1799_v16 }
 0x540   : > { %v1180_v25 = vsel %vm1168_vm3, %v1166_v11, 0.0  ;;  %v1167_v45 = vmul.f32 %v1159_v23, %v1126_v19 }
 0x541   : > { %v1181_v57 = vadd.f32 %v1180_v25, %v1179_v24 }
 0x542   : > { %v1182_v46 = vsel %vm1168_vm3, %v1167_v45, 0.0  ;;  %v1716_v45 = vld [vmem:[%s2361_s6 + $0x18] sm:$0xff] }
 0x543   : > { %v1183_v32 = vadd.f32 %v1182_v46, %v1181_v57  ;;  %v1717_v46 = vld [vmem:[%s2361_s6 + $0x10] sm:$0xff] }
 0x545   : > { %v1184_v33 = vrot.slane %v1183_v32, 4 }
 0x547   : > { %v1185_v36 = vadd.f32 %v1184_v33, %v1183_v32 }
 0x549   : > { %v1186_v52 = vrot.slane %v1185_v36, 2 }
 0x54b   : > { %v1187_v41 = vadd.f32 %v1186_v52, %v1185_v36 }
 0x54d   : > { %v1188_v62 = vrot.slane %v1187_v41, 1 }
 0x54f   : > { %v1189_v37 = vadd.f32 %v1188_v62, %v1187_v41 }
 0x551   : > { %v1190_v39 = vadd.f32 %v1189_v37, %v1135_v0 }
 0x553   : > { %v1191_v40 = vmax.f32 %v1190_v39, 0.0 }
 0x555   : > { %v1195_v53 = vrot.slane %v1191_v40, %v1194_v38 }
 0x557   : > { %v1197_v10 = vmul.f32 %v1195_v53, %v1128_v51  ;;  %v1196_v56 = vmul.f32 %v1195_v53, %v1127_v12  ;;  %v1199_v44 = vmul.f32 %v1195_v53, %v1130_v43  ;;  %v1198_v58 = vmul.f32 %v1195_v53, %v1129_v55 }
 0x558   : > { %v1201_v59 = vmul.f32 %v1195_v53, %v1132_v13  ;;  %v1200_v61 = vmul.f32 %v1195_v53, %v1131_v4  ;;  %v1203_v6 = vmul.f32 %v1195_v53, %v1134_v63  ;;  %v1202_v8 = vmul.f32 %v1195_v53, %v1133_v1 }
 0x559   : > { %v1207_v2 = vsel %vm1168_vm3, %v1197_v10, 0.0  ;;  %v1204_v42 = vsel %vm1168_vm3, %v1196_v56, 0.0  ;;  %v1213_v14 = vsel %vm1168_vm3, %v1199_v44, 0.0  ;;  %v1210_v15 = vsel %vm1168_vm3, %v1198_v58, 0.0 }
 0x55a   : > { %1208 = vadd.xlane.f32.xlu0 %v1207_v2  ;;  %1205 = vadd.xlane.f32.xlu1 %v1204_v42  ;;  %v1219_v3 = vsel %vm1168_vm3, %v1201_v59, 0.0  ;;  %v1216_v5 = vsel %vm1168_vm3, %v1200_v61, 0.0  ;;  %v1225_v9 = vsel %vm1168_vm3, %v1203_v6, 0.0  ;;  %v1222_v7 = vsel %vm1168_vm3, %v1202_v8, 0.0 }
 0x55e   : > { %1214 = vadd.xlane.f32.xlu0 %v1213_v14  ;;  %1211 = vadd.xlane.f32.xlu1 %v1210_v15 }
 0x562   : > { %1220 = vadd.xlane.f32.xlu0 %v1219_v3  ;;  %1217 = vadd.xlane.f32.xlu1 %v1216_v5  ;;  %v1333_v5 = vld [vmem:[%s1927_s19 + $0x8] sm:$0xff] }
 0x566   : > { %1226 = vadd.xlane.f32.xlu0 %v1225_v9  ;;  %1223 = vadd.xlane.f32.xlu1 %v1222_v7  ;;  %v1332_v9 = vld [vmem:[%s1927_s19] sm:$0xff] }
 0x5e7   : > { %v1209_v17 = vpop.xlane.xlu0 %1208  ;;  %v1206_v19 = vpop.xlane.xlu1 %1205 }
 0x5e8   : > { %v1229_v20 = vadd.f32 %v1209_v17, %v1972_v31  ;;  %v1228_v21 = vadd.f32 %v1206_v19, %v1958_v28 }
 0x5ea   : > { %v1472_v11 = vmul.f32 -1.442695, %v1229_v20  ;;  %v1471_v23 = vmul.f32 -1.442695, %v1228_v21  ;;  %v1334_v20 = vld [vmem:[%s1927_s19 + $0x10] sm:$0xff] }
 0x5eb   : > { %v1215_v24 = vpop.xlane.xlu0 %1214  ;;  %v1212_v25 = vpop.xlane.xlu1 %1211 }
 0x5ec   : > { %1684 = vpow2.f32 %v1472_v11  ;;  %v1231_v57 = vadd.f32 %v1716_v45, %v1215_v24  ;;  %v1230_v32 = vadd.f32 %v1717_v46, %v1212_v25  ;;  %v1336_v45 = vld [vmem:[%s1927_s19 + $0x20] sm:$0xff] }
 0x5ed   : > { %1686 = vpow2.f32 %v1471_v23  ;;  %v1335_v23 = vld [vmem:[%s1927_s19 + $0x18] sm:$0xff] }
 0x5ee   : > { %v1474_v33 = vmul.f32 -1.442695, %v1231_v57  ;;  %v1473_v31 = vmul.f32 -1.442695, %v1230_v32 }
 0x5ef   : > { %v1221_v36 = vpop.xlane.xlu0 %1220  ;;  %v1218_v28 = vpop.xlane.xlu1 %1217 }
 0x5f0   : > { %1688 = vpow2.f32 %v1474_v33  ;;  %v1233_v48 = vadd.f32 %v1221_v36, %v1963_v29  ;;  %v1232_v52 = vadd.f32 %v1218_v28, %v1946_v26 }
 0x5f1   : > { %1690 = vpow2.f32 %v1473_v31 }
 0x5f2   : > { %v1475_v41 = vmul.f32 -1.442695, %v1232_v52  ;;  %v1476_v62 = vmul.f32 -1.442695, %v1233_v48 }
 0x5f3   : > { %v1224_v54 = vpop.xlane.xlu1 %1223  ;;  %v1227_v38 = vpop.xlane.xlu0 %1226 }
 0x5f4   : > { %1692 = vpow2.f32 %v1475_v41  ;;  %v1234_v0 = vadd.f32 %v1224_v54, %v1994_v35  ;;  %v1235_v12 = vadd.f32 %v1227_v38, %v1985_v34 }
 0x5f5   : > { %1694 = vpow2.f32 %v1476_v62 }
 0x5f6   : > { %v1685_v37 = vpop.eup %1684  ;;  %v1477_v53 = vmul.f32 -1.442695, %v1234_v0  ;;  %v1478_v55 = vmul.f32 -1.442695, %v1235_v12 }
 0x5f7   : > { %v1687_v39 = vpop.eup %1686  ;;  %v1261_v40 = vadd.f32 1.0, %v1685_v37 }
 0x5f8   : > { %v1260_v51 = vadd.f32 1.0, %v1687_v39 }
 0x5f9   : > { %1696 = vrcp.f32 %v1261_v40 }
 0x5fa   : > { %v1689_v29 = vpop.eup %1688  ;;  %1698 = vrcp.f32 %v1260_v51 }
 0x5fb   : > { %v1691_v26 = vpop.eup %1690  ;;  %1700 = vpow2.f32 %v1477_v53  ;;  %v1263_v10 = vadd.f32 1.0, %v1689_v29 }
 0x5fc   : > { %v1262_v43 = vadd.f32 1.0, %v1691_v26 }
 0x5fe   : > { %1702 = vrcp.f32 %v1262_v43  ;;  %v1693_v56 = vpop.eup %1692 }
 0x5ff   : > { %1704 = vpow2.f32 %v1478_v55  ;;  %v1695_v35 = vpop.eup %1694  ;;  %v1264_v2 = vadd.f32 1.0, %v1693_v56 }
 0x600   : > { %1706 = vrcp.f32 %v1263_v10  ;;  %v1265_v58 = vadd.f32 1.0, %v1695_v35 }
 0x601   : > { %1708 = vrcp.f32 %v1264_v2 }
 0x602   : > { %1710 = vrcp.f32 %v1265_v58 }
 0x603   : > { %v1697_v42 = vpop.eup %1696 }
 0x604   : > { %v1699_v44 = vpop.eup %1698  ;;  %1291 = vperm.xlu0 %1672, %v1697_v42  }
 0x605   : > { %1286 = vperm.xlu1 %1671, %v1699_v44   ;;  %v1701_v34 = vpop.eup %1700 }
 0x606   : > { %v1266_v4 = vadd.f32 1.0, %v1701_v34 }
 0x608   : > { %v1703_v13 = vpop.eup %1702  ;;  %1712 = vrcp.f32 %v1266_v4 }
 0x609   : > { %1296 = vperm.xlu1 %1671, %v1703_v13   ;;  %v1705_v14 = vpop.eup %1704 }
 0x60a   : > { %v1707_v15 = vpop.eup %1706  ;;  %v1267_v59 = vadd.f32 1.0, %v1705_v14 }
 0x60b   : > { %v1709_v61 = vpop.eup %1708 }
 0x60c   : > { %1714 = vrcp.f32 %v1267_v59  ;;  %v1711_v63 = vpop.eup %1710 }
 0x60d   : > { %1301 = vperm.xlu1 %1671, %v1707_v15  }
 0x611   : > { %1306 = vperm.xlu1 %1671, %v1709_v61  }
 0x612   : > { %v1713_v1 = vpop.eup %1712 }
 0x615   : > { %1311 = vperm.xlu1 %1671, %v1711_v63  }
 0x616   : > { %v1715_v3 = vpop.eup %1714 }
 0x619   : > { %1316 = vperm.xlu1 %1671, %v1713_v1  }
 0x61d   : > { %1321 = vperm.xlu1 %1671, %v1715_v3  }
 0x683   : > { %v1292_v6 = vpop.permute.xlu0 %1291 }
 0x684   : > { %v1325_v8 = vmul.f32 %v1292_v6, %v2174_v22  ;;  %v1287_v7 = vpop.permute.xlu1 %1286 }
 0x685   : > { %v1324_v16 = vmul.f32 %v1287_v7, %v2171_v18 }
 0x686   : > { %v1341_v17 = vadd.f32 %v1333_v5, %v1325_v8 }
 0x687   : > { %v1340_v19 = vadd.f32 %v1332_v9, %v1324_v16 }
 0x688   : > { %1349 = vst [vmem:[%s2279_s20 + $0x8] sm:$0xff] %v1341_v17  ;;  %v1297_v21 = vpop.permute.xlu1 %1296 }
 0x689   : > { %1348 = vst [vmem:[%s2279_s20] sm:$0xff] %v1340_v19  ;;  %v1326_v22 = vmul.f32 %v1297_v21, %v2177_v27  ;;  %v1337_v27 = vld [vmem:[%s1927_s19 + $0x28] sm:$0xff] }
 0x68b   : > { %v1342_v11 = vadd.f32 %v1334_v20, %v1326_v22 }
 0x68c   : > { %v1302_v18 = vpop.permute.xlu1 %1301 }
 0x68d   : > { %1350 = vst [vmem:[%s2279_s20 + $0x10] sm:$0xff] %v1342_v11  ;;  %v1327_v24 = vmul.f32 %v1302_v18, %v2180_v30  ;;  %v1338_v30 = vld [vmem:[%s1927_s19 + $0x30] sm:$0xff] }
 0x68f   : > { %v1343_v25 = vadd.f32 %v1335_v23, %v1327_v24 }
 0x690   : > { %v1307_v57 = vpop.permute.xlu1 %1306 }
 0x691   : > { %1351 = vst [vmem:[%s2279_s20 + $0x18] sm:$0xff] %v1343_v25  ;;  %v1328_v46 = vmul.f32 %v1307_v57, %v2183_v60  ;;  %v1339_v60 = vld [vmem:[%s1927_s19 + $0x38] sm:$0xff]  ;;  %s1800_s19 = smov [#allocation4]  }
 0x692   : > { %s1722_s10 = sshll.u32 %s1800_s19, 4  ;;  %s1723_s10 = int_to_ptr.vmem [resolvable:$false] %s1722_s10 }
 0x693   : > { %v1344_v32 = vadd.f32 %v1336_v45, %v1328_v46  ;;  %s1724_s12 = scalar_lea.vmem %s1723_s10, 2048  ;;  %p1725_p2 = scmp.lt.s32.totalorder %s2301_s13, %s1723_s10 }
 0x694   : > { %v1312_v33 = vpop.permute.xlu1 %1311  ;;  %p1726_p3 = scmp.lt.s32.totalorder %s1724_s12, %s1718_s9 }
 0x695   : > { %1352 = vst [vmem:[%s2279_s20 + $0x20] sm:$0xff] %v1344_v32  ;;  %v1329_v31 = vmul.f32 %v1312_v33, %v2186_v47 }
 0x696   : > { %p1727_p4 = por %p1726_p3, %p1725_p2 }
 0x697   : > { %v1345_v36 = vadd.f32 %v1337_v27, %v1329_v31 }
 0x698   : > { %v1317_v28 = vpop.permute.xlu1 %1316  ;;  %p1728_p5 = pnand %p1727_p4, %p1721_p1 }
 0x699   : > { %1353 = vst [vmem:[%s2279_s20 + $0x28] sm:$0xff] %v1345_v36  ;;  %v1330_v48 = vmul.f32 %v1317_v28, %v2188_v49 }
 0x69b   : > { %v1346_v52 = vadd.f32 %v1338_v30, %v1330_v48 }
 0x69c   : > { %v1322_v41 = vpop.permute.xlu1 %1321 }
 0x69d   : > { %1354 = vst [vmem:[%s2279_s20 + $0x30] sm:$0xff] %v1346_v52  ;;  %v1331_v47 = vmul.f32 %v1322_v41, %v2191_v50 }
 0x69f   : > { %v1347_v49 = vadd.f32 %v1339_v60, %v1331_v47 }
 0x6a1   : > { %1355 = vst [vmem:[%s2279_s20 + $0x38] sm:$0xff] %v1347_v49 }
 0x6a2   : > { %1731 = shalt.err (!%p1728_p5)
}
 0x6a3   : > { %s1732_s24 = scalar_lea.hbm %s2308_s25, 1024  ;;  %s1736_s20 = scalar_lea.hbm %s2363_s8, 2048 }
 0x6a4   : > { %p1733_p7 = scmp.ne.s32.totalorder %s2308_s25, %s1732_s24  ;;  %p1737_p12 = scmp.lt.u32.totalorder %s2308_s25, %s2363_s8 }
 0x6a5   : > { %p1738_p13 = scmp.lt.u32.totalorder %s1736_s20, %s1732_s24  ;;  %p1740_p1 = scmp.lt.u32.totalorder %s1732_s24, %s2308_s25 }
 0x6a6   : > { %p1734_p10 = pnand %p1733_p7, %p1887_p6 }
 0x6a7   : > { %p1739_p0 = por %p1738_p13, %p1737_p12 }
 0x6a8   : > { %p1735_p11 = pneg %p1734_p10 }
 0x6a9   : > { %p1741_p2 = por %p1740_p1, %p1739_p0 }
 0x6ab   : > { %p1742_p3 = pnand %p1741_p2, %p1735_p11 }
 0x6ad   : > { %1745 = shalt.err (!%p1742_p3)
}
 0x6ae   : > { %s1801_s23 = smov 128   ;;  %s1802_s9 = smov 256  }
 0x6af   : > { %s1803_s19 = smov 8  }
 0x6b0   : > { %1563 = dma.vmem_to_hbm [thread:$0]  (%p1887_p6), %s2301_s13, 1024, %s2308_s25, %s2313_s26, %s1801_s23, %s1802_s9, %s1803_s19  }
 0x6b1 PF: > { %s1384_s10 = sand.u32 1, %s1768_s27   ;;  %p1566_p4 = pnand %p1439_p9, %p1891_p8 }
 0x6b2   : > { %s1385_s12 = scalar_lea.sflag [#allocation5], %s1384_s10 }
 0x6b3   : > { %1763 = dma.done.wait (!%p1566_p4), %s1385_s12, 1024  }
 0x6b4   : > { %1765 = vsyncadd (!%p1566_p4), %s1385_s12, 4294966272  ;;  %p18_p5 = scmp.ge.s32.totalorder %s1872_s11, 4   ;;  %s2366_s27 = smov %s1772_s28 }
 0x6b5   : > { %s2367_s28 = smov %s1776_s29  ;;  %s2368_s29 = smov %s1885_s14 }
 0x6b6   : > { %s2369_s30 = smov %s1872_s11  ;;  %20 = sbr.rel (!%p18_p5) target bundleno = 3 (0x3), region = 132 }
 0x6bd   :  { %1390 = vsyncpa [#allocation5], 1 }
 0x6be   :  { %1392 = vsyncpa [#allocation5 + $0x1], 1 }

</bundles_post_ra>
